<compile_context>
chip_gen: v7x
topology: tpu7x:2x2x1
jax: 0.10.0
libtpu: 0.0.40
codegen_flags: <defaults>
</compile_context>

<pallas_src>
import math

import jax
import jax.numpy as jnp
from jax import lax
from jax.experimental import pallas as pl
from jax.experimental.pallas import tpu as pltpu


# ---------------------------------------------------------------------------
# Fused Pallas kernel: whole DNANet forward pass
# ---------------------------------------------------------------------------
def _dnanet_kernel(x_ref, adj_ref, w1_ref, b1_ref,
                   wq_ref, bq_ref, wk_ref, bk_ref, wv_ref, bv_ref,
                   w2_ref, b2_ref, o_ref, xall_ref):
    """x_ref  : [N, IN_C]   node features
       adj_ref: [N, N]      GCN-normalized dense adjacency (target, source)
       w1/b1  : lin1, wq/wk/wv/bq/bk/bv: stacked per-conv weights [L, H, H]/[L, 1, H]
       w2/b2  : lin2, o_ref: [N, OUT_C], xall_ref: VMEM scratch [L+1, N, H] (f32)
    """
    num_layers, hidden, _ = wq_ref.shape
    n = x_ref.shape[0]
    scale = 1.0 / math.sqrt(hidden)

    def mm(a, b):
        # bf16 MXU inputs, f32 accumulation.
        return jnp.dot(a.astype(jnp.bfloat16), b.astype(jnp.bfloat16),
                       preferred_element_type=jnp.float32)

    # ---- lin1 + ReLU (dropout p=0.5 is identity in eval mode) ----
    h0 = jnp.maximum(mm(x_ref[...], w1_ref[...]) + b1_ref[...], 0.0)
    xall_ref[0] = h0

    adj = adj_ref[...]                                              # [N, N] f32

    # ---- DNAConv layers (num_layers is static -> fully unrolled) ----
    for layer in range(num_layers):
        L = layer + 1

        # History of layer outputs, flattened for batched projections.
        hist = xall_ref[0:L].reshape(L * n, hidden)                 # [L*N, H] f32
        hist_b = hist.astype(jnp.bfloat16)

        wq = wq_ref[layer].astype(jnp.bfloat16)
        wk = wk_ref[layer].astype(jnp.bfloat16)
        wv = wv_ref[layer].astype(jnp.bfloat16)
        bq, bk, bv = bq_ref[layer], bk_ref[layer], bv_ref[layer]    # [1, H] f32

        # Query from the most recent representation of every (target) node.
        q = jnp.dot(xall_ref[L - 1].astype(jnp.bfloat16), wq,
                    preferred_element_type=jnp.float32) + bq        # [N, H]

        # Batched K / V over ALL history layers: one MXU dot each.
        k = jnp.dot(hist_b, wk, preferred_element_type=jnp.float32) + bk   # [L*N, H]
        v = jnp.dot(hist_b, wv, preferred_element_type=jnp.float32) + bv   # [L*N, H]
        k3 = k.reshape(L, n, hidden)                                # [L, N, H]
        v3 = v.reshape(L, n, hidden).astype(jnp.bfloat16)           # [L, N, H]

        # Attention scores per history layer: s_l[i, j] = q_i . k_{l,j} / sqrt(H)
        qb = q.astype(jnp.bfloat16)
        scores = [lax.dot_general(qb, k3[l].astype(jnp.bfloat16),
                                  (((1,), (1,)), ((), ())),
                                  preferred_element_type=jnp.float32) * scale
                  for l in range(L)]                                # L x [N, N] f32

        # Softmax over the history dimension L for every (target i, source j).
        m = scores[0]
        for l in range(1, L):
            m = jnp.maximum(m, scores[l])
        exps = [jnp.exp(s - m) for s in scores]
        denom = exps[0]
        for l in range(1, L):
            denom = denom + exps[l]

        # Fuse softmax normalization with the GCN norm once (hoisted out of L loop);
        # approximate reciprocal goes to the otherwise-idle EUP slot.
        w_adj = adj * pl.reciprocal(denom, approx=True)             # [N, N] f32

        # Batched aggregation: [L,N,N] x [L,N,H] -> [L,N,H], then reduce over L.
        p3 = jnp.stack([e * w_adj for e in exps], axis=0).astype(jnp.bfloat16)
        out = jnp.einsum("lij,ljh->lih", p3, v3,
                         preferred_element_type=jnp.float32)        # [L, N, H]
        out = jnp.maximum(jnp.sum(out, axis=0), 0.0)                # [N, H]
        xall_ref[L] = out

    # ---- lin2 + log_softmax (dropout identity in eval) ----
    y = mm(xall_ref[num_layers], w2_ref[...]) + b2_ref[...]         # [N, OUT_C]
    mx = jnp.max(y, axis=1, keepdims=True)
    z = y - mx
    lse = jnp.log(jnp.sum(jnp.exp(z), axis=1, keepdims=True))
    o_ref[...] = (z - lse).astype(o_ref.dtype)


# ---------------------------------------------------------------------------
# Wrapper
# ---------------------------------------------------------------------------
def dnanet_forward(x, adj, params):
    n = x.shape[0]
    hidden = params["lin1_w"].shape[1]
    out_c = params["lin2_w"].shape[1]
    num_layers = len(params["convs"])

    # Stack per-conv weights so the kernel takes a fixed number of refs.
    wq = jnp.stack([c["wq"] for c in params["convs"]])                       # [L, H, H]
    wk = jnp.stack([c["wk"] for c in params["convs"]])
    wv = jnp.stack([c["wv"] for c in params["convs"]])
    bq = jnp.stack([c["bq"].reshape(1, hidden) for c in params["convs"]])    # [L, 1, H]
    bk = jnp.stack([c["bk"].reshape(1, hidden) for c in params["convs"]])
    bv = jnp.stack([c["bv"].reshape(1, hidden) for c in params["convs"]])

    vmem = pl.BlockSpec(memory_space=pltpu.MemorySpace.VMEM)
    return pl.pallas_call(
        _dnanet_kernel,
        out_shape=jax.ShapeDtypeStruct((n, out_c), jnp.float32),
        in_specs=[vmem] * 12,
        out_specs=vmem,
        scratch_shapes=[pltpu.VMEM((num_layers + 1, n, hidden), jnp.float32)],
        compiler_params=pltpu.CompilerParams(vmem_limit_bytes=32 * 1024 * 1024),
    )(x, adj,
      params["lin1_w"], params["lin1_b"].reshape(1, hidden),
      wq, bq, wk, bk, wv, bv,
      params["lin2_w"], params["lin2_b"].reshape(1, out_c))


# ---------------------------------------------------------------------------
# Parameter / graph construction (glue, plain JAX)
# ---------------------------------------------------------------------------
def init_params(key, in_channels, hidden, out_channels, num_layers):
    def dense(k, fan_in, fan_out):
        bound = 1.0 / math.sqrt(fan_in)
        kw, kb = jax.random.split(k)
        w = jax.random.uniform(kw, (fan_in, fan_out), jnp.float32, -bound, bound)
        b = jax.random.uniform(kb, (fan_out,), jnp.float32, -bound, bound)
        return w, b

    keys = jax.random.split(key, 2 + 3 * num_layers)
    params = {}
    params["lin1_w"], params["lin1_b"] = dense(keys[0], in_channels, hidden)
    params["lin2_w"], params["lin2_b"] = dense(keys[1], hidden, out_channels)
    convs = []
    for i in range(num_layers):
        kq, kk, kv = keys[2 + 3 * i], keys[3 + 3 * i], keys[4 + 3 * i]
        wq, bq = dense(kq, hidden, hidden)
        wk, bk = dense(kk, hidden, hidden)
        wv, bv = dense(kv, hidden, hidden)
        convs.append(dict(wq=wq, bq=bq, wk=wk, bk=bk, wv=wv, bv=bv))
    params["convs"] = convs
    return params


def build_normalized_adj(edge_index, num_nodes):
    """Dense GCN norm (add_self_loops=True, symmetric): A[i,j] = mask * d_i^-1/2 d_j^-1/2.

    Note: uses row-sum (in-degree incl. self-loop); matches PyG gcn_norm for
    undirected edge lists like the ring graph used here.
    """
    src, dst = edge_index
    a = jnp.zeros((num_nodes, num_nodes), jnp.float32)
    a = a.at[dst, src].set(1.0)                              # edge j -> i
    idx = jnp.arange(num_nodes)
    a = a.at[idx, idx].set(1.0)                              # self loops
    deg = jnp.sum(a, axis=1)
    dinv = jnp.where(deg > 0, 1.0 / jnp.sqrt(deg), 0.0)
    return a * dinv[:, None] * dinv[None, :]


# ---------------------------------------------------------------------------
# Main
# ---------------------------------------------------------------------------
if __name__ == "__main__":
    N, IN_C, HIDDEN, OUT_C, NUM_LAYERS = 8, 16, 32, 4, 3

    key = jax.random.PRNGKey(0)
    k_x, k_p = jax.random.split(key)

    # Node features  (data.x)
    x = jax.random.normal(k_x, (N, IN_C), jnp.float32)

    # Ring graph edge_index (data.edge_index): i <-> i+1 (mod N), 2N directed edges.
    i = jnp.arange(N)
    src = jnp.concatenate([i, (i + 1) % N])
    dst = jnp.concatenate([(i + 1) % N, i])
    adj = build_normalized_adj((src, dst), N)

    params = init_params(k_p, IN_C, HIDDEN, OUT_C, NUM_LAYERS)

    out = dnanet_forward(x, adj, params)
    out = jax.block_until_ready(out)
    assert out.shape == (N, OUT_C)
    # log_softmax rows should sum (in prob space) to ~1 (softmax itself is f32)
    assert bool(jnp.all(jnp.abs(jnp.sum(jnp.exp(out), axis=1) - 1.0) < 1e-3))
    print("KERNEL_OK")
</pallas_src>

<mosaic_0001>
module attributes {stable_mosaic.version = 11 : i64} {
  func.func @_dnanet_kernel(%arg0: memref<8x16xf32, #tpu.memory_space<vmem>>, %arg1: memref<8x8xf32, #tpu.memory_space<vmem>>, %arg2: memref<16x32xf32, #tpu.memory_space<vmem>>, %arg3: memref<1x32xf32, #tpu.memory_space<vmem>>, %arg4: memref<3x32x32xf32, #tpu.memory_space<vmem>>, %arg5: memref<3x1x32xf32, #tpu.memory_space<vmem>>, %arg6: memref<3x32x32xf32, #tpu.memory_space<vmem>>, %arg7: memref<3x1x32xf32, #tpu.memory_space<vmem>>, %arg8: memref<3x32x32xf32, #tpu.memory_space<vmem>>, %arg9: memref<3x1x32xf32, #tpu.memory_space<vmem>>, %arg10: memref<32x4xf32, #tpu.memory_space<vmem>>, %arg11: memref<1x4xf32, #tpu.memory_space<vmem>>, %arg12: memref<8x4xf32, #tpu.memory_space<vmem>>, %arg13: memref<4x8x32xf32, #tpu.memory_space<vmem>>) attributes {dimension_semantics = [], scalar_prefetch = 0 : i64, scratch_operands = 1 : i64, tpu.core_type = #tpu.core_type<tc>} {
    %c0 = arith.constant 0 : index
    %c0_0 = arith.constant 0 : index
    %0 = vector.load %arg0[%c0, %c0_0] : memref<8x16xf32, #tpu.memory_space<vmem>>, vector<8x16xf32>
    %c0_1 = arith.constant 0 : index
    %c0_2 = arith.constant 0 : index
    %1 = vector.load %arg2[%c0_1, %c0_2] : memref<16x32xf32, #tpu.memory_space<vmem>>, vector<16x32xf32>
    %2 = arith.truncf %0 : vector<8x16xf32> to vector<8x16xbf16>
    %3 = arith.truncf %1 : vector<16x32xf32> to vector<16x32xbf16>
    %cst = arith.constant dense<0.000000e+00> : vector<8x32xf32>
    %4 = tpu.matmul %2, %3, %cst {dimension_numbers = #tpu.dot_dimension_numbers<[1], [0], [0], [1], [0, 0, 1, 1], [], []>} : vector<8x16xbf16>, vector<16x32xbf16>, vector<8x32xf32> -> vector<8x32xf32>
    %c0_3 = arith.constant 0 : index
    %c0_4 = arith.constant 0 : index
    %5 = vector.load %arg3[%c0_3, %c0_4] : memref<1x32xf32, #tpu.memory_space<vmem>>, vector<1x32xf32>
    %6 = vector.broadcast %5 : vector<1x32xf32> to vector<8x32xf32>
    %7 = arith.addf %4, %6 : vector<8x32xf32>
    %cst_5 = arith.constant 0.000000e+00 : f32
    %8 = vector.broadcast %cst_5 : f32 to vector<8x32xf32>
    %9 = arith.maximumf %7, %8 : vector<8x32xf32>
    %c0_6 = arith.constant 0 : index
    %c0_7 = arith.constant 0 : index
    %c0_8 = arith.constant 0 : index
    %10 = vector.load %arg13[%c0_6, %c0_7, %c0_8] : memref<4x8x32xf32, #tpu.memory_space<vmem>>, vector<1x8x32xf32>
    %11 = vector.shape_cast %10 : vector<1x8x32xf32> to vector<8x32xf32>
    %12 = vector.shape_cast %9 : vector<8x32xf32> to vector<1x8x32xf32>
    tpu.vector_store %arg13[%c0_6, %c0_7, %c0_8], %12 {strides = array<i32>} : memref<4x8x32xf32, #tpu.memory_space<vmem>>, vector<1x8x32xf32>,
    %c0_9 = arith.constant 0 : index
    %c0_10 = arith.constant 0 : index
    %13 = vector.load %arg1[%c0_9, %c0_10] : memref<8x8xf32, #tpu.memory_space<vmem>>, vector<8x8xf32>
    %c0_11 = arith.constant 0 : index
    %c0_12 = arith.constant 0 : index
    %c0_13 = arith.constant 0 : index
    %14 = vector.load %arg13[%c0_11, %c0_12, %c0_13] : memref<4x8x32xf32, #tpu.memory_space<vmem>>, vector<1x8x32xf32>
    %15 = vector.shape_cast %14 : vector<1x8x32xf32> to vector<8x32xf32>
    %16 = arith.truncf %15 : vector<8x32xf32> to vector<8x32xbf16>
    %c0_14 = arith.constant 0 : index
    %c0_15 = arith.constant 0 : index
    %c0_16 = arith.constant 0 : index
    %17 = vector.load %arg4[%c0_14, %c0_15, %c0_16] : memref<3x32x32xf32, #tpu.memory_space<vmem>>, vector<1x32x32xf32>
    %18 = vector.shape_cast %17 : vector<1x32x32xf32> to vector<32x32xf32>
    %19 = arith.truncf %18 : vector<32x32xf32> to vector<32x32xbf16>
    %c0_17 = arith.constant 0 : index
    %c0_18 = arith.constant 0 : index
    %c0_19 = arith.constant 0 : index
    %20 = vector.load %arg6[%c0_17, %c0_18, %c0_19] : memref<3x32x32xf32, #tpu.memory_space<vmem>>, vector<1x32x32xf32>
    %21 = vector.shape_cast %20 : vector<1x32x32xf32> to vector<32x32xf32>
    %22 = arith.truncf %21 : vector<32x32xf32> to vector<32x32xbf16>
    %c0_20 = arith.constant 0 : index
    %c0_21 = arith.constant 0 : index
    %c0_22 = arith.constant 0 : index
    %23 = vector.load %arg8[%c0_20, %c0_21, %c0_22] : memref<3x32x32xf32, #tpu.memory_space<vmem>>, vector<1x32x32xf32>
    %24 = vector.shape_cast %23 : vector<1x32x32xf32> to vector<32x32xf32>
    %25 = arith.truncf %24 : vector<32x32xf32> to vector<32x32xbf16>
    %c0_23 = arith.constant 0 : index
    %c0_24 = arith.constant 0 : index
    %c0_25 = arith.constant 0 : index
    %26 = vector.load %arg5[%c0_23, %c0_24, %c0_25] : memref<3x1x32xf32, #tpu.memory_space<vmem>>, vector<1x1x32xf32>
    %27 = vector.shape_cast %26 : vector<1x1x32xf32> to vector<1x32xf32>
    %c0_26 = arith.constant 0 : index
    %c0_27 = arith.constant 0 : index
    %c0_28 = arith.constant 0 : index
    %28 = vector.load %arg7[%c0_26, %c0_27, %c0_28] : memref<3x1x32xf32, #tpu.memory_space<vmem>>, vector<1x1x32xf32>
    %29 = vector.shape_cast %28 : vector<1x1x32xf32> to vector<1x32xf32>
    %c0_29 = arith.constant 0 : index
    %c0_30 = arith.constant 0 : index
    %c0_31 = arith.constant 0 : index
    %30 = vector.load %arg9[%c0_29, %c0_30, %c0_31] : memref<3x1x32xf32, #tpu.memory_space<vmem>>, vector<1x1x32xf32>
    %31 = vector.shape_cast %30 : vector<1x1x32xf32> to vector<1x32xf32>
    %c0_32 = arith.constant 0 : index
    %c0_33 = arith.constant 0 : index
    %c0_34 = arith.constant 0 : index
    %32 = vector.load %arg13[%c0_32, %c0_33, %c0_34] : memref<4x8x32xf32, #tpu.memory_space<vmem>>, vector<1x8x32xf32>
    %33 = vector.shape_cast %32 : vector<1x8x32xf32> to vector<8x32xf32>
    %34 = arith.truncf %33 : vector<8x32xf32> to vector<8x32xbf16>
    %cst_35 = arith.constant dense<0.000000e+00> : vector<8x32xf32>
    %35 = tpu.matmul %34, %19, %cst_35 {dimension_numbers = #tpu.dot_dimension_numbers<[1], [0], [0], [1], [0, 0, 1, 1], [], []>} : vector<8x32xbf16>, vector<32x32xbf16>, vector<8x32xf32> -> vector<8x32xf32>
    %36 = vector.broadcast %27 : vector<1x32xf32> to vector<8x32xf32>
    %37 = arith.addf %35, %36 : vector<8x32xf32>
    %cst_36 = arith.constant dense<0.000000e+00> : vector<8x32xf32>
    %38 = tpu.matmul %16, %22, %cst_36 {dimension_numbers = #tpu.dot_dimension_numbers<[1], [0], [0], [1], [0, 0, 1, 1], [], []>} : vector<8x32xbf16>, vector<32x32xbf16>, vector<8x32xf32> -> vector<8x32xf32>
    %39 = vector.broadcast %29 : vector<1x32xf32> to vector<8x32xf32>
    %40 = arith.addf %38, %39 : vector<8x32xf32>
    %cst_37 = arith.constant dense<0.000000e+00> : vector<8x32xf32>
    %41 = tpu.matmul %16, %25, %cst_37 {dimension_numbers = #tpu.dot_dimension_numbers<[1], [0], [0], [1], [0, 0, 1, 1], [], []>} : vector<8x32xbf16>, vector<32x32xbf16>, vector<8x32xf32> -> vector<8x32xf32>
    %42 = vector.broadcast %31 : vector<1x32xf32> to vector<8x32xf32>
    %43 = arith.addf %41, %42 : vector<8x32xf32>
    %44 = vector.shape_cast %40 : vector<8x32xf32> to vector<1x8x32xf32>
    %45 = vector.shape_cast %43 : vector<8x32xf32> to vector<1x8x32xf32>
    %46 = arith.truncf %45 : vector<1x8x32xf32> to vector<1x8x32xbf16>
    %47 = arith.truncf %37 : vector<8x32xf32> to vector<8x32xbf16>
    %48 = vector.shape_cast %44 : vector<1x8x32xf32> to vector<8x32xf32>
    %49 = arith.truncf %48 : vector<8x32xf32> to vector<8x32xbf16>
    %cst_38 = arith.constant dense<0.000000e+00> : vector<8x8xf32>
    %50 = tpu.matmul %47, %49, %cst_38 {dimension_numbers = #tpu.dot_dimension_numbers<[1], [1], [0], [0], [0, 0, 1, 0], [], []>} : vector<8x32xbf16>, vector<8x32xbf16>, vector<8x8xf32> -> vector<8x8xf32>
    %cst_39 = arith.constant 0.176776692 : f32
    %51 = vector.broadcast %cst_39 : f32 to vector<8x8xf32>
    %52 = arith.mulf %50, %51 : vector<8x8xf32>
    %53 = arith.subf %52, %52 : vector<8x8xf32>
    %54 = math.exp %53 : vector<8x8xf32>
    %55 = tpu.reciprocal %54 {approx = true} : vector<8x8xf32> -> vector<8x8xf32>
    %56 = arith.mulf %13, %55 : vector<8x8xf32>
    %57 = arith.mulf %54, %56 : vector<8x8xf32>
    %58 = vector.shape_cast %57 : vector<8x8xf32> to vector<1x8x8xf32>
    %59 = arith.truncf %58 : vector<1x8x8xf32> to vector<1x8x8xbf16>
    "tpu.trace_start"() <{level = 10 : i32, message = "lij,ljh->lih"}> : () -> ()
    %cst_40 = arith.constant dense<0.000000e+00> : vector<1x8x32xf32>
    %60 = tpu.matmul %59, %46, %cst_40 {dimension_numbers = #tpu.dot_dimension_numbers<[2], [1], [1], [2], [0, 0, 0, 1, 1, 2], [0], [0]>} : vector<1x8x8xbf16>, vector<1x8x32xbf16>, vector<1x8x32xf32> -> vector<1x8x32xf32>
    "tpu.trace_stop"() : () -> ()
    %cst_41 = arith.constant dense<0.000000e+00> : vector<8x32xf32>
    %61 = vector.multi_reduction <add>, %60, %cst_41 [0] : vector<1x8x32xf32> to vector<8x32xf32>
    %cst_42 = arith.constant 0.000000e+00 : f32
    %62 = vector.broadcast %cst_42 : f32 to vector<8x32xf32>
    %63 = arith.maximumf %61, %62 : vector<8x32xf32>
    %c1 = arith.constant 1 : index
    %c0_43 = arith.constant 0 : index
    %c0_44 = arith.constant 0 : index
    %64 = vector.load %arg13[%c1, %c0_43, %c0_44] : memref<4x8x32xf32, #tpu.memory_space<vmem>>, vector<1x8x32xf32>
    %65 = vector.shape_cast %64 : vector<1x8x32xf32> to vector<8x32xf32>
    %66 = vector.shape_cast %63 : vector<8x32xf32> to vector<1x8x32xf32>
    tpu.vector_store %arg13[%c1, %c0_43, %c0_44], %66 {strides = array<i32>} : memref<4x8x32xf32, #tpu.memory_space<vmem>>, vector<1x8x32xf32>,
    %c0_45 = arith.constant 0 : index
    %c0_46 = arith.constant 0 : index
    %c0_47 = arith.constant 0 : index
    %67 = vector.load %arg13[%c0_45, %c0_46, %c0_47] : memref<4x8x32xf32, #tpu.memory_space<vmem>>, vector<2x8x32xf32>
    %68 = vector.shape_cast %67 : vector<2x8x32xf32> to vector<16x32xf32>
    %69 = arith.truncf %68 : vector<16x32xf32> to vector<16x32xbf16>
    %c1_48 = arith.constant 1 : index
    %c0_49 = arith.constant 0 : index
    %c0_50 = arith.constant 0 : index
    %70 = vector.load %arg4[%c1_48, %c0_49, %c0_50] : memref<3x32x32xf32, #tpu.memory_space<vmem>>, vector<1x32x32xf32>
    %71 = vector.shape_cast %70 : vector<1x32x32xf32> to vector<32x32xf32>
    %72 = arith.truncf %71 : vector<32x32xf32> to vector<32x32xbf16>
    %c1_51 = arith.constant 1 : index
    %c0_52 = arith.constant 0 : index
    %c0_53 = arith.constant 0 : index
    %73 = vector.load %arg6[%c1_51, %c0_52, %c0_53] : memref<3x32x32xf32, #tpu.memory_space<vmem>>, vector<1x32x32xf32>
    %74 = vector.shape_cast %73 : vector<1x32x32xf32> to vector<32x32xf32>
    %75 = arith.truncf %74 : vector<32x32xf32> to vector<32x32xbf16>
    %c1_54 = arith.constant 1 : index
    %c0_55 = arith.constant 0 : index
    %c0_56 = arith.constant 0 : index
    %76 = vector.load %arg8[%c1_54, %c0_55, %c0_56] : memref<3x32x32xf32, #tpu.memory_space<vmem>>, vector<1x32x32xf32>
    %77 = vector.shape_cast %76 : vector<1x32x32xf32> to vector<32x32xf32>
    %78 = arith.truncf %77 : vector<32x32xf32> to vector<32x32xbf16>
    %c1_57 = arith.constant 1 : index
    %c0_58 = arith.constant 0 : index
    %c0_59 = arith.constant 0 : index
    %79 = vector.load %arg5[%c1_57, %c0_58, %c0_59] : memref<3x1x32xf32, #tpu.memory_space<vmem>>, vector<1x1x32xf32>
    %80 = vector.shape_cast %79 : vector<1x1x32xf32> to vector<1x32xf32>
    %c1_60 = arith.constant 1 : index
    %c0_61 = arith.constant 0 : index
    %c0_62 = arith.constant 0 : index
    %81 = vector.load %arg7[%c1_60, %c0_61, %c0_62] : memref<3x1x32xf32, #tpu.memory_space<vmem>>, vector<1x1x32xf32>
    %82 = vector.shape_cast %81 : vector<1x1x32xf32> to vector<1x32xf32>
    %c1_63 = arith.constant 1 : index
    %c0_64 = arith.constant 0 : index
    %c0_65 = arith.constant 0 : index
    %83 = vector.load %arg9[%c1_63, %c0_64, %c0_65] : memref<3x1x32xf32, #tpu.memory_space<vmem>>, vector<1x1x32xf32>
    %84 = vector.shape_cast %83 : vector<1x1x32xf32> to vector<1x32xf32>
    %c1_66 = arith.constant 1 : index
    %c0_67 = arith.constant 0 : index
    %c0_68 = arith.constant 0 : index
    %85 = vector.load %arg13[%c1_66, %c0_67, %c0_68] : memref<4x8x32xf32, #tpu.memory_space<vmem>>, vector<1x8x32xf32>
    %86 = vector.shape_cast %85 : vector<1x8x32xf32> to vector<8x32xf32>
    %87 = arith.truncf %86 : vector<8x32xf32> to vector<8x32xbf16>
    %cst_69 = arith.constant dense<0.000000e+00> : vector<8x32xf32>
    %88 = tpu.matmul %87, %72, %cst_69 {dimension_numbers = #tpu.dot_dimension_numbers<[1], [0], [0], [1], [0, 0, 1, 1], [], []>} : vector<8x32xbf16>, vector<32x32xbf16>, vector<8x32xf32> -> vector<8x32xf32>
    %89 = vector.broadcast %80 : vector<1x32xf32> to vector<8x32xf32>
    %90 = arith.addf %88, %89 : vector<8x32xf32>
    %cst_70 = arith.constant dense<0.000000e+00> : vector<16x32xf32>
    %91 = tpu.matmul %69, %75, %cst_70 {dimension_numbers = #tpu.dot_dimension_numbers<[1], [0], [0], [1], [0, 0, 1, 1], [], []>} : vector<16x32xbf16>, vector<32x32xbf16>, vector<16x32xf32> -> vector<16x32xf32>
    %92 = vector.broadcast %82 : vector<1x32xf32> to vector<16x32xf32>
    %93 = arith.addf %91, %92 : vector<16x32xf32>
    %cst_71 = arith.constant dense<0.000000e+00> : vector<16x32xf32>
    %94 = tpu.matmul %69, %78, %cst_71 {dimension_numbers = #tpu.dot_dimension_numbers<[1], [0], [0], [1], [0, 0, 1, 1], [], []>} : vector<16x32xbf16>, vector<32x32xbf16>, vector<16x32xf32> -> vector<16x32xf32>
    %95 = vector.broadcast %84 : vector<1x32xf32> to vector<16x32xf32>
    %96 = arith.addf %94, %95 : vector<16x32xf32>
    %97 = vector.shape_cast %93 : vector<16x32xf32> to vector<2x8x32xf32>
    %98 = vector.shape_cast %96 : vector<16x32xf32> to vector<2x8x32xf32>
    %99 = arith.truncf %98 : vector<2x8x32xf32> to vector<2x8x32xbf16>
    %100 = arith.truncf %90 : vector<8x32xf32> to vector<8x32xbf16>
    %101 = vector.extract_strided_slice %97 {offsets = [0, 0, 0], sizes = [1, 8, 32], strides = [1, 1, 1]} : vector<2x8x32xf32> to vector<1x8x32xf32>
    %102 = vector.shape_cast %101 : vector<1x8x32xf32> to vector<8x32xf32>
    %103 = arith.truncf %102 : vector<8x32xf32> to vector<8x32xbf16>
    %cst_72 = arith.constant dense<0.000000e+00> : vector<8x8xf32>
    %104 = tpu.matmul %100, %103, %cst_72 {dimension_numbers = #tpu.dot_dimension_numbers<[1], [1], [0], [0], [0, 0, 1, 0], [], []>} : vector<8x32xbf16>, vector<8x32xbf16>, vector<8x8xf32> -> vector<8x8xf32>
    %cst_73 = arith.constant 0.176776692 : f32
    %105 = vector.broadcast %cst_73 : f32 to vector<8x8xf32>
    %106 = arith.mulf %104, %105 : vector<8x8xf32>
    %107 = vector.extract_strided_slice %97 {offsets = [1, 0, 0], sizes = [1, 8, 32], strides = [1, 1, 1]} : vector<2x8x32xf32> to vector<1x8x32xf32>
    %108 = vector.shape_cast %107 : vector<1x8x32xf32> to vector<8x32xf32>
    %109 = arith.truncf %108 : vector<8x32xf32> to vector<8x32xbf16>
    %cst_74 = arith.constant dense<0.000000e+00> : vector<8x8xf32>
    %110 = tpu.matmul %100, %109, %cst_74 {dimension_numbers = #tpu.dot_dimension_numbers<[1], [1], [0], [0], [0, 0, 1, 0], [], []>} : vector<8x32xbf16>, vector<8x32xbf16>, vector<8x8xf32> -> vector<8x8xf32>
    %cst_75 = arith.constant 0.176776692 : f32
    %111 = vector.broadcast %cst_75 : f32 to vector<8x8xf32>
    %112 = arith.mulf %110, %111 : vector<8x8xf32>
    %113 = arith.maximumf %106, %112 : vector<8x8xf32>
    %114 = arith.subf %106, %113 : vector<8x8xf32>
    %115 = math.exp %114 : vector<8x8xf32>
    %116 = arith.subf %112, %113 : vector<8x8xf32>
    %117 = math.exp %116 : vector<8x8xf32>
    %118 = arith.addf %115, %117 : vector<8x8xf32>
    %119 = tpu.reciprocal %118 {approx = true} : vector<8x8xf32> -> vector<8x8xf32>
    %120 = arith.mulf %13, %119 : vector<8x8xf32>
    %121 = arith.mulf %115, %120 : vector<8x8xf32>
    %122 = arith.mulf %117, %120 : vector<8x8xf32>
    %123 = vector.shape_cast %121 : vector<8x8xf32> to vector<1x8x8xf32>
    %124 = vector.shape_cast %122 : vector<8x8xf32> to vector<1x8x8xf32>
    %125 = tpu.concatenate %123, %124 in 0 : vector<1x8x8xf32>, vector<1x8x8xf32> -> vector<2x8x8xf32>
    %126 = arith.truncf %125 : vector<2x8x8xf32> to vector<2x8x8xbf16>
    "tpu.trace_start"() <{level = 10 : i32, message = "lij,ljh->lih"}> : () -> ()
    %cst_76 = arith.constant dense<0.000000e+00> : vector<2x8x32xf32>
    %127 = tpu.matmul %126, %99, %cst_76 {dimension_numbers = #tpu.dot_dimension_numbers<[2], [1], [1], [2], [0, 0, 0, 1, 1, 2], [0], [0]>} : vector<2x8x8xbf16>, vector<2x8x32xbf16>, vector<2x8x32xf32> -> vector<2x8x32xf32>
    "tpu.trace_stop"() : () -> ()
    %cst_77 = arith.constant dense<0.000000e+00> : vector<8x32xf32>
    %128 = vector.multi_reduction <add>, %127, %cst_77 [0] : vector<2x8x32xf32> to vector<8x32xf32>
    %cst_78 = arith.constant 0.000000e+00 : f32
    %129 = vector.broadcast %cst_78 : f32 to vector<8x32xf32>
    %130 = arith.maximumf %128, %129 : vector<8x32xf32>
    %c2 = arith.constant 2 : index
    %c0_79 = arith.constant 0 : index
    %c0_80 = arith.constant 0 : index
    %131 = vector.load %arg13[%c2, %c0_79, %c0_80] : memref<4x8x32xf32, #tpu.memory_space<vmem>>, vector<1x8x32xf32>
    %132 = vector.shape_cast %131 : vector<1x8x32xf32> to vector<8x32xf32>
    %133 = vector.shape_cast %130 : vector<8x32xf32> to vector<1x8x32xf32>
    tpu.vector_store %arg13[%c2, %c0_79, %c0_80], %133 {strides = array<i32>} : memref<4x8x32xf32, #tpu.memory_space<vmem>>, vector<1x8x32xf32>,
    %c0_81 = arith.constant 0 : index
    %c0_82 = arith.constant 0 : index
    %c0_83 = arith.constant 0 : index
    %134 = vector.load %arg13[%c0_81, %c0_82, %c0_83] : memref<4x8x32xf32, #tpu.memory_space<vmem>>, vector<3x8x32xf32>
    %135 = vector.shape_cast %134 : vector<3x8x32xf32> to vector<24x32xf32>
    %136 = arith.truncf %135 : vector<24x32xf32> to vector<24x32xbf16>
    %c2_84 = arith.constant 2 : index
    %c0_85 = arith.constant 0 : index
    %c0_86 = arith.constant 0 : index
    %137 = vector.load %arg4[%c2_84, %c0_85, %c0_86] : memref<3x32x32xf32, #tpu.memory_space<vmem>>, vector<1x32x32xf32>
    %138 = vector.shape_cast %137 : vector<1x32x32xf32> to vector<32x32xf32>
    %139 = arith.truncf %138 : vector<32x32xf32> to vector<32x32xbf16>
    %c2_87 = arith.constant 2 : index
    %c0_88 = arith.constant 0 : index
    %c0_89 = arith.constant 0 : index
    %140 = vector.load %arg6[%c2_87, %c0_88, %c0_89] : memref<3x32x32xf32, #tpu.memory_space<vmem>>, vector<1x32x32xf32>
    %141 = vector.shape_cast %140 : vector<1x32x32xf32> to vector<32x32xf32>
    %142 = arith.truncf %141 : vector<32x32xf32> to vector<32x32xbf16>
    %c2_90 = arith.constant 2 : index
    %c0_91 = arith.constant 0 : index
    %c0_92 = arith.constant 0 : index
    %143 = vector.load %arg8[%c2_90, %c0_91, %c0_92] : memref<3x32x32xf32, #tpu.memory_space<vmem>>, vector<1x32x32xf32>
    %144 = vector.shape_cast %143 : vector<1x32x32xf32> to vector<32x32xf32>
    %145 = arith.truncf %144 : vector<32x32xf32> to vector<32x32xbf16>
    %c2_93 = arith.constant 2 : index
    %c0_94 = arith.constant 0 : index
    %c0_95 = arith.constant 0 : index
    %146 = vector.load %arg5[%c2_93, %c0_94, %c0_95] : memref<3x1x32xf32, #tpu.memory_space<vmem>>, vector<1x1x32xf32>
    %147 = vector.shape_cast %146 : vector<1x1x32xf32> to vector<1x32xf32>
    %c2_96 = arith.constant 2 : index
    %c0_97 = arith.constant 0 : index
    %c0_98 = arith.constant 0 : index
    %148 = vector.load %arg7[%c2_96, %c0_97, %c0_98] : memref<3x1x32xf32, #tpu.memory_space<vmem>>, vector<1x1x32xf32>
    %149 = vector.shape_cast %148 : vector<1x1x32xf32> to vector<1x32xf32>
    %c2_99 = arith.constant 2 : index
    %c0_100 = arith.constant 0 : index
    %c0_101 = arith.constant 0 : index
    %150 = vector.load %arg9[%c2_99, %c0_100, %c0_101] : memref<3x1x32xf32, #tpu.memory_space<vmem>>, vector<1x1x32xf32>
    %151 = vector.shape_cast %150 : vector<1x1x32xf32> to vector<1x32xf32>
    %c2_102 = arith.constant 2 : index
    %c0_103 = arith.constant 0 : index
    %c0_104 = arith.constant 0 : index
    %152 = vector.load %arg13[%c2_102, %c0_103, %c0_104] : memref<4x8x32xf32, #tpu.memory_space<vmem>>, vector<1x8x32xf32>
    %153 = vector.shape_cast %152 : vector<1x8x32xf32> to vector<8x32xf32>
    %154 = arith.truncf %153 : vector<8x32xf32> to vector<8x32xbf16>
    %cst_105 = arith.constant dense<0.000000e+00> : vector<8x32xf32>
    %155 = tpu.matmul %154, %139, %cst_105 {dimension_numbers = #tpu.dot_dimension_numbers<[1], [0], [0], [1], [0, 0, 1, 1], [], []>} : vector<8x32xbf16>, vector<32x32xbf16>, vector<8x32xf32> -> vector<8x32xf32>
    %156 = vector.broadcast %147 : vector<1x32xf32> to vector<8x32xf32>
    %157 = arith.addf %155, %156 : vector<8x32xf32>
    %cst_106 = arith.constant dense<0.000000e+00> : vector<24x32xf32>
    %158 = tpu.matmul %136, %142, %cst_106 {dimension_numbers = #tpu.dot_dimension_numbers<[1], [0], [0], [1], [0, 0, 1, 1], [], []>} : vector<24x32xbf16>, vector<32x32xbf16>, vector<24x32xf32> -> vector<24x32xf32>
    %159 = vector.broadcast %149 : vector<1x32xf32> to vector<24x32xf32>
    %160 = arith.addf %158, %159 : vector<24x32xf32>
    %cst_107 = arith.constant dense<0.000000e+00> : vector<24x32xf32>
    %161 = tpu.matmul %136, %145, %cst_107 {dimension_numbers = #tpu.dot_dimension_numbers<[1], [0], [0], [1], [0, 0, 1, 1], [], []>} : vector<24x32xbf16>, vector<32x32xbf16>, vector<24x32xf32> -> vector<24x32xf32>
    %162 = vector.broadcast %151 : vector<1x32xf32> to vector<24x32xf32>
    %163 = arith.addf %161, %162 : vector<24x32xf32>
    %164 = vector.shape_cast %160 : vector<24x32xf32> to vector<3x8x32xf32>
    %165 = vector.shape_cast %163 : vector<24x32xf32> to vector<3x8x32xf32>
    %166 = arith.truncf %165 : vector<3x8x32xf32> to vector<3x8x32xbf16>
    %167 = arith.truncf %157 : vector<8x32xf32> to vector<8x32xbf16>
    %168 = vector.extract_strided_slice %164 {offsets = [0, 0, 0], sizes = [1, 8, 32], strides = [1, 1, 1]} : vector<3x8x32xf32> to vector<1x8x32xf32>
    %169 = vector.shape_cast %168 : vector<1x8x32xf32> to vector<8x32xf32>
    %170 = arith.truncf %169 : vector<8x32xf32> to vector<8x32xbf16>
    %cst_108 = arith.constant dense<0.000000e+00> : vector<8x8xf32>
    %171 = tpu.matmul %167, %170, %cst_108 {dimension_numbers = #tpu.dot_dimension_numbers<[1], [1], [0], [0], [0, 0, 1, 0], [], []>} : vector<8x32xbf16>, vector<8x32xbf16>, vector<8x8xf32> -> vector<8x8xf32>
    %cst_109 = arith.constant 0.176776692 : f32
    %172 = vector.broadcast %cst_109 : f32 to vector<8x8xf32>
    %173 = arith.mulf %171, %172 : vector<8x8xf32>
    %174 = vector.extract_strided_slice %164 {offsets = [1, 0, 0], sizes = [1, 8, 32], strides = [1, 1, 1]} : vector<3x8x32xf32> to vector<1x8x32xf32>
    %175 = vector.shape_cast %174 : vector<1x8x32xf32> to vector<8x32xf32>
    %176 = arith.truncf %175 : vector<8x32xf32> to vector<8x32xbf16>
    %cst_110 = arith.constant dense<0.000000e+00> : vector<8x8xf32>
    %177 = tpu.matmul %167, %176, %cst_110 {dimension_numbers = #tpu.dot_dimension_numbers<[1], [1], [0], [0], [0, 0, 1, 0], [], []>} : vector<8x32xbf16>, vector<8x32xbf16>, vector<8x8xf32> -> vector<8x8xf32>
    %cst_111 = arith.constant 0.176776692 : f32
    %178 = vector.broadcast %cst_111 : f32 to vector<8x8xf32>
    %179 = arith.mulf %177, %178 : vector<8x8xf32>
    %180 = vector.extract_strided_slice %164 {offsets = [2, 0, 0], sizes = [1, 8, 32], strides = [1, 1, 1]} : vector<3x8x32xf32> to vector<1x8x32xf32>
    %181 = vector.shape_cast %180 : vector<1x8x32xf32> to vector<8x32xf32>
    %182 = arith.truncf %181 : vector<8x32xf32> to vector<8x32xbf16>
    %cst_112 = arith.constant dense<0.000000e+00> : vector<8x8xf32>
    %183 = tpu.matmul %167, %182, %cst_112 {dimension_numbers = #tpu.dot_dimension_numbers<[1], [1], [0], [0], [0, 0, 1, 0], [], []>} : vector<8x32xbf16>, vector<8x32xbf16>, vector<8x8xf32> -> vector<8x8xf32>
    %cst_113 = arith.constant 0.176776692 : f32
    %184 = vector.broadcast %cst_113 : f32 to vector<8x8xf32>
    %185 = arith.mulf %183, %184 : vector<8x8xf32>
    %186 = arith.maximumf %173, %179 : vector<8x8xf32>
    %187 = arith.maximumf %186, %185 : vector<8x8xf32>
    %188 = arith.subf %173, %187 : vector<8x8xf32>
    %189 = math.exp %188 : vector<8x8xf32>
    %190 = arith.subf %179, %187 : vector<8x8xf32>
    %191 = math.exp %190 : vector<8x8xf32>
    %192 = arith.subf %185, %187 : vector<8x8xf32>
    %193 = math.exp %192 : vector<8x8xf32>
    %194 = arith.addf %189, %191 : vector<8x8xf32>
    %195 = arith.addf %194, %193 : vector<8x8xf32>
    %196 = tpu.reciprocal %195 {approx = true} : vector<8x8xf32> -> vector<8x8xf32>
    %197 = arith.mulf %13, %196 : vector<8x8xf32>
    %198 = arith.mulf %189, %197 : vector<8x8xf32>
    %199 = arith.mulf %191, %197 : vector<8x8xf32>
    %200 = arith.mulf %193, %197 : vector<8x8xf32>
    %201 = vector.shape_cast %198 : vector<8x8xf32> to vector<1x8x8xf32>
    %202 = vector.shape_cast %199 : vector<8x8xf32> to vector<1x8x8xf32>
    %203 = vector.shape_cast %200 : vector<8x8xf32> to vector<1x8x8xf32>
    %204 = tpu.concatenate %201, %202, %203 in 0 : vector<1x8x8xf32>, vector<1x8x8xf32>, vector<1x8x8xf32> -> vector<3x8x8xf32>
    %205 = arith.truncf %204 : vector<3x8x8xf32> to vector<3x8x8xbf16>
    "tpu.trace_start"() <{level = 10 : i32, message = "lij,ljh->lih"}> : () -> ()
    %cst_114 = arith.constant dense<0.000000e+00> : vector<3x8x32xf32>
    %206 = tpu.matmul %205, %166, %cst_114 {dimension_numbers = #tpu.dot_dimension_numbers<[2], [1], [1], [2], [0, 0, 0, 1, 1, 2], [0], [0]>} : vector<3x8x8xbf16>, vector<3x8x32xbf16>, vector<3x8x32xf32> -> vector<3x8x32xf32>
    "tpu.trace_stop"() : () -> ()
    %cst_115 = arith.constant dense<0.000000e+00> : vector<8x32xf32>
    %207 = vector.multi_reduction <add>, %206, %cst_115 [0] : vector<3x8x32xf32> to vector<8x32xf32>
    %cst_116 = arith.constant 0.000000e+00 : f32
    %208 = vector.broadcast %cst_116 : f32 to vector<8x32xf32>
    %209 = arith.maximumf %207, %208 : vector<8x32xf32>
    %c3 = arith.constant 3 : index
    %c0_117 = arith.constant 0 : index
    %c0_118 = arith.constant 0 : index
    %210 = vector.load %arg13[%c3, %c0_117, %c0_118] : memref<4x8x32xf32, #tpu.memory_space<vmem>>, vector<1x8x32xf32>
    %211 = vector.shape_cast %210 : vector<1x8x32xf32> to vector<8x32xf32>
    %212 = vector.shape_cast %209 : vector<8x32xf32> to vector<1x8x32xf32>
    tpu.vector_store %arg13[%c3, %c0_117, %c0_118], %212 {strides = array<i32>} : memref<4x8x32xf32, #tpu.memory_space<vmem>>, vector<1x8x32xf32>,
    %c3_119 = arith.constant 3 : index
    %c0_120 = arith.constant 0 : index
    %c0_121 = arith.constant 0 : index
    %213 = vector.load %arg13[%c3_119, %c0_120, %c0_121] : memref<4x8x32xf32, #tpu.memory_space<vmem>>, vector<1x8x32xf32>
    %214 = vector.shape_cast %213 : vector<1x8x32xf32> to vector<8x32xf32>
    %c0_122 = arith.constant 0 : index
    %c0_123 = arith.constant 0 : index
    %215 = vector.load %arg10[%c0_122, %c0_123] : memref<32x4xf32, #tpu.memory_space<vmem>>, vector<32x4xf32>
    %216 = arith.truncf %214 : vector<8x32xf32> to vector<8x32xbf16>
    %217 = arith.truncf %215 : vector<32x4xf32> to vector<32x4xbf16>
    %cst_124 = arith.constant dense<0.000000e+00> : vector<8x4xf32>
    %218 = tpu.matmul %216, %217, %cst_124 {dimension_numbers = #tpu.dot_dimension_numbers<[1], [0], [0], [1], [0, 0, 1, 1], [], []>} : vector<8x32xbf16>, vector<32x4xbf16>, vector<8x4xf32> -> vector<8x4xf32>
    %c0_125 = arith.constant 0 : index
    %c0_126 = arith.constant 0 : index
    %219 = vector.load %arg11[%c0_125, %c0_126] : memref<1x4xf32, #tpu.memory_space<vmem>>, vector<1x4xf32>
    %220 = vector.broadcast %219 : vector<1x4xf32> to vector<8x4xf32>
    %221 = arith.addf %218, %220 : vector<8x4xf32>
    %cst_127 = arith.constant dense<0xFF800000> : vector<8xf32>
    %222 = vector.multi_reduction <maximumf>, %221, %cst_127 [1] : vector<8x4xf32> to vector<8xf32>
    %223 = vector.shape_cast %222 : vector<8xf32> to vector<8x1xf32>
    %224 = vector.broadcast %223 : vector<8x1xf32> to vector<8x4xf32>
    %225 = arith.subf %221, %224 : vector<8x4xf32>
    %226 = math.exp %225 : vector<8x4xf32>
    %cst_128 = arith.constant dense<0.000000e+00> : vector<8xf32>
    %227 = vector.multi_reduction <add>, %226, %cst_128 [1] : vector<8x4xf32> to vector<8xf32>
    %228 = vector.shape_cast %227 : vector<8xf32> to vector<8x1xf32>
    %229 = math.log %228 : vector<8x1xf32>
    %230 = vector.broadcast %229 : vector<8x1xf32> to vector<8x4xf32>
    %231 = arith.subf %225, %230 : vector<8x4xf32>
    %c0_129 = arith.constant 0 : index
    %c0_130 = arith.constant 0 : index
    %232 = vector.load %arg12[%c0_129, %c0_130] : memref<8x4xf32, #tpu.memory_space<vmem>>, vector<8x4xf32>
    tpu.vector_store %arg12[%c0_129, %c0_130], %231 {strides = array<i32>} : memref<8x4xf32, #tpu.memory_space<vmem>>, vector<8x4xf32>,
    return
  }
}

</mosaic_0001>

<bundles_post_ra>
// kernel: tpu_custom_call.1
= control target key start
LH: loop header
LB: loop body
LE: loop exit
PB: predicated region body
PF: predicated region fallthrough
CT: control target
= control target key end

     0   :  { %17 = vsyncpa [#allocation4], 0  ;;  %s2065_s0 = inlined_call_operand.vmem [shape: f32[8,16], index: 0, kind: input, shape index: {}]   ;;  %s2066_s1 = inlined_call_operand.vmem [shape: f32[8,8], index: 1, kind: input, shape index: {}]   ;;  %s2067_s2 = inlined_call_operand.vmem [shape: f32[16,32], index: 2, kind: input, shape index: {}]   ;;  %s2068_s3 = inlined_call_operand.vmem [shape: f32[1,32], index: 3, kind: input, shape index: {}]   ;;  %s2069_s4 = inlined_call_operand.hbm [shape: f32[3,32,32], index: 4, kind: input, shape index: {}]   ;;  %s2070_s5 = inlined_call_operand.vmem [shape: f32[3,1,32], index: 5, kind: input, shape index: {}]   ;;  %s2071_s6 = inlined_call_operand.hbm [shape: f32[3,32,32], index: 6, kind: input, shape index: {}]   ;;  %s2072_s7 = inlined_call_operand.vmem [shape: f32[3,1,32], index: 7, kind: input, shape index: {}]   ;;  %s2073_s8 = inlined_call_operand.hbm [shape: f32[3,32,32], index: 8, kind: input, shape index: {}]   ;;  %s2074_s9 = inlined_call_operand.vmem [shape: f32[3,1,32], index: 9, kind: input, shape index: {}]   ;;  %s2075_s10 = inlined_call_operand.vmem [shape: f32[32,4], index: 10, kind: input, shape index: {}]   ;;  %s2076_s11 = inlined_call_operand.vmem [shape: f32[1,4], index: 11, kind: input, shape index: {}]   ;;  %s2077_s12 = inlined_call_operand.vmem [shape: f32[8,4], index: 12, kind: output, shape index: {}]  }
   0x1   :  { %18 = vsyncpa [#allocation6], 0  ;;  %s1742_s21 = smov [#allocation5]   ;;  %s1743_s23 = smov [#allocation3]  }
   0x2   :  { %s46_s22 = sshll.u32 %s1742_s21, 4  ;;  %s32_s24 = sshll.u32 %s1743_s23, 4  ;;  %s47_s22 = int_to_ptr.vmem [resolvable:$true] %s46_s22  ;;  %s1814_s24 = int_to_ptr.vmem [resolvable:$true] %s32_s24 }
   0x3   :  { %s1672_s27 = scalar_lea.hbm %s2071_s6, 1536 }
   0x4   :  { %p1673_p0 = scmp.ne.s32.totalorder %s2071_s6, %s1672_s27  ;;  %p1676_p1 = scmp.lt.u32.totalorder %s1672_s27, %s2071_s6 }
   0x6   :  { %p1678_p2 = pnand %p1676_p1, %p1673_p0 }
   0x8   :  { %1681 = shalt.err (!%p1678_p2)
}
   0x9   :  { %s1682_s14 = scalar_lea.vmem %s47_s22, 1536  ;;  %p1687_p4 = scmp.lt.s32.totalorder %s47_s22, %s47_s22 }
   0xa   :  { %p1683_p3 = scmp.ne.s32.totalorder %s47_s22, %s1682_s14  ;;  %p1688_p5 = scmp.lt.s32.totalorder %s1682_s14, %s1682_s14 }
   0xc   :  { %p1689_p6 = por %p1688_p5, %p1687_p4 }
   0xe   :  { %p1690_p7 = pnand %p1689_p6, %p1683_p3 }
  0x10   :  { %1693 = shalt.err (!%p1690_p7)
}
  0x11   :  { %s1744_s15 = smov 128   ;;  %s1745_s16 = smov 8  }
  0x12   :  { %52 = dma.hbm_to_vmem [thread:$0]  %s2071_s6, 1536, %s47_s22, [#allocation6], %s1744_s15, %s1744_s15, %s1745_s16  }
  0x13   :  { %s1694_s21 = scalar_lea.hbm %s2069_s4, 1536 }
  0x14   :  { %p1695_p8 = scmp.ne.s32.totalorder %s2069_s4, %s1694_s21  ;;  %p1698_p9 = scmp.lt.u32.totalorder %s1694_s21, %s2069_s4 }
  0x16   :  { %p1700_p10 = pnand %p1698_p9, %p1695_p8 }
  0x18   :  { %1703 = shalt.err (!%p1700_p10)
}
  0x19   :  { %s1704_s28 = scalar_lea.vmem %s1814_s24, 1536  ;;  %p1709_p12 = scmp.lt.s32.totalorder %s1814_s24, %s1814_s24 }
  0x1a   :  { %p1705_p11 = scmp.ne.s32.totalorder %s1814_s24, %s1704_s28  ;;  %p1710_p13 = scmp.lt.s32.totalorder %s1704_s28, %s1704_s28 }
  0x1c   :  { %p1711_p0 = por %p1710_p13, %p1709_p12 }
  0x1e   :  { %p1712_p1 = pnand %p1711_p0, %p1705_p11 }
  0x20   :  { %1715 = shalt.err (!%p1712_p1)
}
  0x21   :  { %38 = dma.hbm_to_vmem [thread:$0]  %s2069_s4, 1536, %s1814_s24, [#allocation4], %s1744_s15, %s1744_s15, %s1745_s16  }
  0x22   :  { %s1746_s29 = smov [#allocation7]   ;;  %s1716_s17 = scalar_lea.hbm %s2073_s8, 1536 }
  0x23   :  { %s60_s30 = sshll.u32 %s1746_s29, 4  ;;  %p1717_p2 = scmp.ne.s32.totalorder %s2073_s8, %s1716_s17  ;;  %s61_s30 = int_to_ptr.vmem [resolvable:$true] %s60_s30 }
  0x24   :  { %p1720_p3 = scmp.lt.u32.totalorder %s1716_s17, %s2073_s8 }
  0x26   :  { %p1722_p4 = pnand %p1720_p3, %p1717_p2 }
  0x28   :  { %1725 = shalt.err (!%p1722_p4)
}
  0x29   :  { %s1726_s23 = scalar_lea.vmem %s61_s30, 1536  ;;  %p1731_p6 = scmp.lt.s32.totalorder %s61_s30, %s61_s30 }
  0x2a   :  { %p1727_p5 = scmp.ne.s32.totalorder %s61_s30, %s1726_s23  ;;  %p1732_p7 = scmp.lt.s32.totalorder %s1726_s23, %s1726_s23 }
  0x2c   :  { %p1733_p8 = por %p1732_p7, %p1731_p6 }
  0x2e   :  { %p1734_p9 = pnand %p1733_p8, %p1727_p5 }
  0x30   :  { %1737 = shalt.err (!%p1734_p9)
}
  0x31   :  { %66 = dma.hbm_to_vmem [thread:$0]  %s2073_s8, 1536, %s61_s30, [#allocation6], %s1744_s15, %s1744_s15, %s1745_s16  }
  0x32   :  { %1738 = dma.done.wait [#allocation4], 1536  }
  0x33   :  { %1739 = vsyncadd [#allocation4], 4294965760 }
  0x34   :  { %1740 = dma.done.wait [#allocation6], 3072  }
  0x35   :  { %1741 = vsyncadd [#allocation6], 4294964224  ;;  %v1747_v0 = vmov 0.0   ;;  %vm1748_vm0 = vmmov 0   ;;  %v84_v1 = vld [vmem:[%s2067_s2] sm:$0xff]  ;;  %v85_v2 = vld [vmem:[%s2067_s2 + $0x8] sm:$0xff] }
  0x36   :  { %1485 = vmatprep.subr.bf16.mxu0 %v1747_v0  ;;  %1487 = vmatprep.mubr.msk.bf16.mxu0 %vm1748_vm0, %v1747_v0  ;;  %v83_v3 = vld [vmem:[%s2065_s0] sm:$0xff]  ;;  %v87_v4 = vpack.c.bf16 %v85_v2, %v84_v1  ;;  %vm95_vm1 = vcmask 130048   ;;  %v146_v7 = vld [vmem:[#allocation3 + $0x8] sm:$0xff]  ;;  %v147_v11 = vld [vmem:[#allocation3 + $0x10] sm:$0xff]  ;;  %vm140_vm2 = vcmask 261120   ;;  %vm368_vm3 = vcmask 1043456  }
  0x37   :  { %1491 = vmatprep.subr.bf16.mxu1 %v1747_v0  ;;  %1495 = vmatprep.mubr.msk.bf16.mxu1 %vm1748_vm0, %v1747_v0  ;;  %v86_v5 = vpack.c.bf16 %v83_v3, %v83_v3  ;;  %v145_v6 = vld [vmem:[#allocation3] sm:$0xff]  ;;  %v152_v10 = vld [vmem:[#allocation5 + $0x8] sm:$0xff]  ;;  %v148_v12 = vld [vmem:[#allocation3 + $0x18] sm:$0xff]  ;;  %vm364_vm4 = vcmask 64512   ;;  %vm1365_vm5 = vcmask 31744  }
  0x38   :  { %1486 = vmatpush3.bf16.msra.mxu0 %v87_v4  ;;  %v151_v8 = vld [vmem:[#allocation5] sm:$0xff]  ;;  %v149_v9 = vpack.c.bf16 %v146_v7, %v145_v6  ;;  %v153_v14 = vld [vmem:[#allocation5 + $0x10] sm:$0xff]  ;;  %v154_v15 = vld [vmem:[#allocation5 + $0x18] sm:$0xff]  ;;  %v150_v16 = vpack.c.bf16 %v148_v12, %v147_v11 }
  0x39   :  { %1499 = vmatprep.subr.bf16.mxu0 %v1747_v0  ;;  %v155_v13 = vpack.c.bf16 %v152_v10, %v151_v8  ;;  %v156_v17 = vpack.c.bf16 %v154_v15, %v153_v14  ;;  %v1385_v18 = vld [vmem:[%s2068_s3] ss:$0 sm:$0xff]  ;;  %v158_v26 = vld [vmem:[#allocation7 + $0x8] sm:$0xff]  ;;  %v159_v30 = vld [vmem:[#allocation7 + $0x10] sm:$0xff] }
  0x3a   :  { %1492 = vmatpush3.bf16.msra.mxu1 %v149_v9  ;;  %v157_v25 = vld [vmem:[#allocation7] sm:$0xff]  ;;  %v160_v31 = vld [vmem:[#allocation7 + $0x18] sm:$0xff]  ;;  %v420_v7 = vld [vmem:[#allocation3 + $0x28] sm:$0xff] }
  0x3b   :  { %1488 = vmatmul.mubr.msk.bf16.vlgmr.msra.gmra.mrb[0].mxu0 %vm95_vm1, %v86_v5  ;;  %1493 = vmatprep.subr.bf16.mxu1 %v1747_v0  ;;  %v161_v28 = vpack.c.bf16 %v158_v26, %v157_v25  ;;  %v162_v32 = vpack.c.bf16 %v160_v31, %v159_v30  ;;  %v1389_v33 = vld [vmem:[%s2072_s7] ss:$0 sm:$0xff]  ;;  %v427_v10 = vld [vmem:[#allocation5 + $0x28] sm:$0xff]  ;;  %v421_v11 = vld [vmem:[#allocation3 + $0x30] sm:$0xff] }
  0x3c   :  { %1503 = vmatprep.mubr.msk.bf16.mxu0 %vm1748_vm0, %v1747_v0  ;;  %1500 = vmatpush3.bf16.msra.mxu0 %v155_v13  ;;  %v1387_v44 = vld [vmem:[%s2070_s5] ss:$0 sm:$0xff]  ;;  %v422_v12 = vld [vmem:[#allocation3 + $0x38] sm:$0xff]  ;;  %v428_v14 = vld [vmem:[#allocation5 + $0x30] sm:$0xff] }
  0x3d   :  { %1501 = vmatprep.subr.bf16.mxu0 %v1747_v0  ;;  %v1391_v46 = vld [vmem:[%s2074_s9] ss:$0 sm:$0xff]  ;;  %v429_v15 = vld [vmem:[#allocation5 + $0x38] sm:$0xff]  ;;  %v435_v30 = vld [vmem:[#allocation7 + $0x30] sm:$0xff] }
  0x3e   :  { %1494 = vmatpush3.bf16.msra.mxu1 %v150_v16  ;;  %v1926_v1 = vld [vmem:[%s2066_s1] sm:$0xff]  ;;  %v424_v16 = vpack.c.bf16 %v422_v12, %v421_v11  ;;  %v436_v31 = vld [vmem:[#allocation7 + $0x38] sm:$0xff] }
  0x3f   :  { %1507 = vmatprep.subr.bf16.mxu1 %v1747_v0  ;;  %v419_v6 = vld [vmem:[#allocation3 + $0x20] sm:$0xff] }
  0x40   :  { %1502 = vmatpush3.bf16.msra.mxu0 %v156_v17  ;;  %v426_v8 = vld [vmem:[#allocation5 + $0x20] sm:$0xff]  ;;  %v423_v9 = vpack.c.bf16 %v420_v7, %v419_v6  ;;  %v431_v17 = vpack.c.bf16 %v429_v15, %v428_v14 }
  0x41   :  { %1515 = vmatprep.subr.bf16.mxu0 %v1747_v0  ;;  %v430_v13 = vpack.c.bf16 %v427_v10, %v426_v8 }
 0x10e   :  { %v133_v19 = vpop.f32.mrb[0].mxu0 }
 0x10f   :  { %v134_v20 = vadd.f32 %v1385_v18, %v133_v19  ;;  %v1489_v21 = vpop.f32.mrb[1].mxu0 }
 0x110   :  { %v136_v22 = vpop.f32.mrb[2].mxu0 }
 0x111   :  { %v139_v23 = vmax.f32 %v134_v20, 0.0  ;;  %v1490_v24 = vpop.f32.mrb[3].mxu0 }
 0x112   :  { %v434_v24 = vld [vmem:[#allocation7 + $0x28] sm:$0xff] }
 0x113   :  { %141 = vst.msk [vmem:[#allocation2] sm:$0xff] %vm140_vm2, %v139_v23  ;;  %v433_v23 = vld [vmem:[#allocation7 + $0x20] sm:$0xff] }
 0x114   :  { %v437_v26 = vpack.c.bf16 %v434_v24, %v433_v23  ;;  %v814_v23 = vld [vmem:[#allocation5 + $0x40] sm:$0xff]  ;;  %v815_v24 = vld [vmem:[#allocation5 + $0x48] sm:$0xff] }
 0x11a   :  { %v1892_v27 = vld [vmem:[#allocation2] sm:$0xff] }
 0x11b   :  { %v144_v29 = vpack.c.bf16 %v1892_v27, %v1892_v27 }
 0x11d   :  { %1496 = vmatmul.mubr.msk.bf16.vlgmr.msra.gmra.mrb[0].mxu1 %vm140_vm2, %v144_v29  ;;  %1504 = vmatmul.mubr.msk.bf16.vlgmr.msra.gmra.mrb[4].mxu0 %vm140_vm2, %v144_v29 }
 0x11e   :  { %1508 = vmatpush3.bf16.msra.mxu1 %v161_v28  ;;  %1511 = vmatprep.mubr.msk.bf16.mxu1 %vm1748_vm0, %v1747_v0 }
 0x11f   :  { %1509 = vmatprep.subr.bf16.mxu1 %v1747_v0  ;;  %1517 = vmatprep.mubr.msk.bf16.mxu0 %vm1748_vm0, %v1747_v0 }
 0x122   :  { %1510 = vmatpush3.bf16.msra.mxu1 %v162_v32  ;;  %v438_v32 = vpack.c.bf16 %v436_v31, %v435_v30  ;;  %v816_v30 = vld [vmem:[#allocation5 + $0x50] sm:$0xff] }
 0x123   :  { %1521 = vmatprep.subr.bf16.mxu1 %v1747_v0 }
 0x125   :  { %1512 = vmatmul.mubr.msk.bf16.vlgmr.msra.gmra.mrb[4].mxu1 %vm140_vm2, %v144_v29 }
 0x126   :  { %1523 = vmatprep.mubr.msk.bf16.mxu1 %vm1748_vm0, %v1747_v0 }
 0x1f0   :  { %v209_v34 = vpop.f32.mrb[0].mxu1  ;;  %v255_v35 = vpop.f32.mrb[4].mxu0 }
 0x1f1   :  { %v256_v36 = vadd.f32 %v1389_v33, %v255_v35  ;;  %v1497_v37 = vpop.f32.mrb[1].mxu1  ;;  %v1505_v38 = vpop.f32.mrb[5].mxu0  ;;  %v210_v47 = vadd.f32 %v1387_v44, %v209_v34  ;;  %v1398_v44 = vld [vmem:[%s2070_s5 + $0x1] ss:$0 sm:$0xff] }
 0x1f2   :  { %v212_v39 = vpop.f32.mrb[2].mxu1  ;;  %v258_v40 = vpop.f32.mrb[6].mxu0 }
 0x1f3   :  { %v309_v41 = vpack.c.bf16 %v256_v36, %v256_v36  ;;  %v1498_v42 = vpop.f32.mrb[3].mxu1  ;;  %v1506_v43 = vpop.f32.mrb[7].mxu0  ;;  %v308_v52 = vpack.c.bf16 %v210_v47, %v210_v47  ;;  %v1402_v47 = vld [vmem:[%s2074_s9 + $0x1] ss:$0 sm:$0xff] }
 0x1f5   :  { %v314_v45 = vsel %vm140_vm2, %v309_v41, 0 }
 0x1f6   :  { %1516 = vmatpush3.bf16.xpose.msra.mxu0 %v314_v45 }
 0x1f7   :  { %1527 = vmatprep.subr.bf16.mxu0 %v1747_v0 }
 0x1f8   :  { %v301_v48 = vpop.f32.mrb[4].mxu1 }
 0x1f9   :  { %v302_v49 = vadd.f32 %v1391_v46, %v301_v48  ;;  %v1513_v50 = vpop.f32.mrb[5].mxu1 }
 0x1fa   :  { %v304_v51 = vpop.f32.mrb[6].mxu1 }
 0x1fb   :  { %v307_v53 = vpack.c.bf16 %v302_v49, %v302_v49  ;;  %v1514_v54 = vpop.f32.mrb[7].mxu1 }
 0x1fd   :  { %v370_v55 = vsel %vm368_vm3, %v307_v53, 0  ;;  %1518 = vmatmul.mubr.msk.bf16.vlgmr.msra.gmra.mrb[8].mxu0 %vm140_vm2, %v308_v52 }
 0x1fe   :  { %1522 = vmatpush3.bf16.msra.mxu1 %v370_v55  ;;  %1531 = vmatprep.mubr.msk.bf16.mxu0 %vm1748_vm0, %v1747_v0 }
 0x1ff   :  { %1535 = vmatprep.subr.bf16.mxu1 %v1747_v0  ;;  %1528 = vmatpush3.bf16.msra.mxu0 %v423_v9 }
 0x200   :  { %1529 = vmatprep.subr.bf16.mxu0 %v1747_v0 }
 0x203   :  { %1530 = vmatpush3.bf16.msra.mxu0 %v424_v16 }
 0x204   :  { %1543 = vmatprep.subr.bf16.mxu0 %v1747_v0 }
 0x2d0   :  { %v350_v56 = vpop.f32.mrb[8].mxu0 }
 0x2d1   :  { %v356_v57 = vmul.f32 0.17677669, %v350_v56  ;;  %v1519_v58 = vpop.f32.mrb[9].mxu0 }
 0x2d2   :  { %v353_v59 = vpop.f32.mrb[10].mxu0 }
 0x2d3   :  { %v357_v60 = vsub.f32 %v356_v57, %v356_v57  ;;  %v1520_v61 = vpop.f32.mrb[11].mxu0 }
 0x2d5   :  { %v358_v62 = vmul.f32 1.442695, %v357_v60 }
 0x2d7   :  { %1650 = vpow2.f32 %v358_v62 }
 0x2e1   :  { %v1651_v63 = vpop.eup %1650 }
 0x2e2   :  { %1652 = vrcp.f32 %v1651_v63 }
 0x2ec   :  { %v1653_v2 = vpop.eup %1652 }
 0x2ed   :  { %v361_v3 = vmul.f32 %v1653_v2, %v1926_v1 }
 0x2ef   :  { %v362_v4 = vmul.f32 %v1651_v63, %v361_v3 }
 0x2f1   :  { %v363_v5 = vpack.c.bf16 %v362_v4, %v362_v4 }
 0x2f3   :  { %1524 = vmatmul.mubr.msk.bf16.vlgmr.msra.gmra.mrb[8].mxu1 %vm364_vm4, %v363_v5 }
 0x2f4   :  { %1539 = vmatprep.mubr.msk.bf16.mxu1 %vm1748_vm0, %v1747_v0  ;;  %1536 = vmatpush3.bf16.msra.mxu1 %v430_v13 }
 0x2f5   :  { %1537 = vmatprep.subr.bf16.mxu1 %v1747_v0 }
 0x2f8   :  { %1538 = vmatpush3.bf16.msra.mxu1 %v431_v17 }
 0x2f9   :  { %1551 = vmatprep.subr.bf16.mxu1 %v1747_v0 }
 0x3c6   :  { %v406_v18 = vpop.f32.mrb[8].mxu1 }
 0x3c7   :  { %v412_v19 = vmax.f32 %v406_v18, 0.0  ;;  %v1525_v20 = vpop.f32.mrb[9].mxu1 }
 0x3c8   :  { %v409_v21 = vpop.f32.mrb[10].mxu1 }
 0x3c9   :  { %414 = vst.msk [vmem:[#allocation2 + $0x8] sm:$0xff] %vm140_vm2, %v412_v19  ;;  %v1526_v22 = vpop.f32.mrb[11].mxu1 }
 0x3d0   :  { %v445_v25 = vld [vmem:[#allocation2 + $0x8] sm:$0xff] }
 0x3d1   :  { %v446_v28 = vpack.c.bf16 %v445_v25, %v445_v25  ;;  %v1938_v29 = vpack.c.bf16 %v445_v25, %v1892_v27  ;;  %v1400_v27 = vld [vmem:[%s2072_s7 + $0x1] ss:$0 sm:$0xff]  ;;  %v818_v25 = vpack.c.bf16 %v815_v24, %v814_v23 }
 0x3d3   :  { %1532 = vmatmul.mubr.msk.bf16.vlgmr.msra.gmra.mrb[12].mxu0 %vm140_vm2, %v446_v28  ;;  %1540 = vmatmul.mubr.msk.bf16.vlgmr.msra.gmra.mrb[12].mxu1 %vm140_vm2, %v1938_v29  ;;  %v808_v28 = vld [vmem:[#allocation3 + $0x48] sm:$0xff] }
 0x3d4   :  { %1544 = vmatpush3.bf16.msra.mxu0 %v437_v26  ;;  %1547 = vmatprep.mubr.msk.bf16.mxu0 %vm1748_vm0, %v1747_v0  ;;  %v807_v26 = vld [vmem:[#allocation3 + $0x40] sm:$0xff] }
 0x3d5   :  { %1545 = vmatprep.subr.bf16.mxu0 %v1747_v0  ;;  %1553 = vmatprep.mubr.msk.bf16.mxu1 %vm1748_vm0, %v1747_v0  ;;  %v811_v31 = vpack.c.bf16 %v808_v28, %v807_v26 }
 0x3d8   :  { %1546 = vmatpush3.bf16.msra.mxu0 %v438_v32  ;;  %v817_v32 = vld [vmem:[#allocation5 + $0x58] sm:$0xff] }
 0x3d9   :  { %1557 = vmatprep.subr.bf16.mxu0 %v1747_v0 }
 0x3db   :  { %1548 = vmatmul.mubr.msk.bf16.vlgmr.msra.gmra.mrb[16].mxu0 %vm140_vm2, %v1938_v29 }
 0x3dc   :  { %1559 = vmatprep.mubr.msk.bf16.mxu0 %vm1748_vm0, %v1747_v0 }
 0x4a6   :  { %v490_v33 = vpop.f32.mrb[12].mxu0  ;;  %v539_v34 = vpop.f32.mrb[12].mxu1 }
 0x4a7   :  { %v540_v35 = vadd.f32 %v1400_v27, %v539_v34  ;;  %v1533_v36 = vpop.f32.mrb[13].mxu0  ;;  %v1541_v37 = vpop.f32.mrb[13].mxu1  ;;  %v491_v48 = vadd.f32 %v1398_v44, %v490_v33  ;;  %v810_v33 = vld [vmem:[#allocation3 + $0x58] sm:$0xff]  ;;  %v819_v34 = vpack.c.bf16 %v817_v32, %v816_v30 }
 0x4a8   :  { %v493_v38 = vpop.f32.mrb[14].mxu0  ;;  %v542_v39 = vpop.f32.mrb[14].mxu1  ;;  %v821_v36 = vld [vmem:[#allocation7 + $0x40] sm:$0xff]  ;;  %v822_v37 = vld [vmem:[#allocation7 + $0x48] sm:$0xff] }
 0x4a9   :  { %v596_v40 = vpack.c.bf16 %v540_v35, %v540_v35  ;;  %v543_v41 = vadd.f32 %v1400_v27, %v542_v39  ;;  %v1534_v42 = vpop.f32.mrb[15].mxu0  ;;  %v1542_v43 = vpop.f32.mrb[15].mxu1  ;;  %v595_v54 = vpack.c.bf16 %v491_v48, %v491_v48  ;;  %v809_v27 = vld [vmem:[#allocation3 + $0x50] sm:$0xff]  ;;  %v825_v38 = vpack.c.bf16 %v822_v37, %v821_v36 }
 0x4aa   :  { %v812_v35 = vpack.c.bf16 %v810_v33, %v809_v27 }
 0x4ab   :  { %v601_v45 = vsel %vm140_vm2, %v596_v40, 0  ;;  %v644_v46 = vpack.c.bf16 %v543_v41, %v543_v41 }
 0x4ac   :  { %1552 = vmatpush3.bf16.xpose.msra.mxu1 %v601_v45 }
 0x4ad   :  { %v646_v49 = vsel %vm140_vm2, %v644_v46, 0  ;;  %1563 = vmatprep.subr.bf16.mxu1 %v1747_v0 }
 0x4ae   :  { %v586_v50 = vpop.f32.mrb[16].mxu0  ;;  %1558 = vmatpush3.bf16.xpose.msra.mxu0 %v646_v49 }
 0x4af   :  { %v587_v51 = vadd.f32 %v1402_v47, %v586_v50  ;;  %v1549_v52 = vpop.f32.mrb[17].mxu0  ;;  %1569 = vmatprep.subr.bf16.mxu0 %v1747_v0 }
 0x4b0   :  { %v589_v53 = vpop.f32.mrb[18].mxu0  ;;  %v824_v52 = vld [vmem:[#allocation7 + $0x58] sm:$0xff] }
 0x4b1   :  { %v593_v55 = vpack.c.bf16 %v587_v51, %v587_v51  ;;  %v590_v56 = vadd.f32 %v1402_v47, %v589_v53  ;;  %v1550_v57 = vpop.f32.mrb[19].mxu0  ;;  %v823_v51 = vld [vmem:[#allocation7 + $0x50] sm:$0xff] }
 0x4b3   :  { %v707_v58 = vsel %vm368_vm3, %v593_v55, 0  ;;  %v594_v59 = vpack.c.bf16 %v590_v56, %v590_v56  ;;  %1554 = vmatmul.mubr.msk.bf16.vlgmr.msra.gmra.mrb[16].mxu1 %vm140_vm2, %v595_v54  ;;  %v826_v55 = vpack.c.bf16 %v824_v52, %v823_v51  ;;  %v1413_v56 = vld [vmem:[%s2072_s7 + $0x2] ss:$0 sm:$0xff] }
 0x4b4   :  { %1564 = vmatpush3.bf16.msra.mxu1 %v707_v58  ;;  %1565 = vmatprep.mubr.msk.bf16.mxu1 %vm1748_vm0, %v1747_v0 }
 0x4b5   :  { %v753_v60 = vsel %vm368_vm3, %v594_v59, 0  ;;  %1560 = vmatmul.mubr.msk.bf16.vlgmr.msra.gmra.mrb[20].mxu0 %vm140_vm2, %v595_v54  ;;  %1575 = vmatprep.subr.bf16.mxu1 %v1747_v0 }
 0x4b6   :  { %1570 = vmatpush3.bf16.msra.mxu0 %v753_v60  ;;  %1571 = vmatprep.mubr.msk.bf16.mxu0 %vm1748_vm0, %v1747_v0 }
 0x4b7   :  { %1583 = vmatprep.subr.bf16.mxu0 %v818_v25 }
 0x586   :  { %v637_v61 = vpop.f32.mrb[16].mxu1 }
 0x587   :  { %v1555_v62 = vpop.f32.mrb[17].mxu1  ;;  %v643_v3 = vmul.f32 0.17677669, %v637_v61 }
 0x588   :  { %v640_v63 = vpop.f32.mrb[18].mxu1  ;;  %v682_v2 = vpop.f32.mrb[20].mxu0 }
 0x589   :  { %v688_v4 = vmul.f32 0.17677669, %v682_v2  ;;  %v1556_v5 = vpop.f32.mrb[19].mxu1  ;;  %v1561_v6 = vpop.f32.mrb[21].mxu0 }
 0x58a   :  { %v685_v7 = vpop.f32.mrb[22].mxu0  ;;  %v1411_v5 = vld [vmem:[%s2070_s5 + $0x2] ss:$0 sm:$0xff] }
 0x58b   :  { %v689_v8 = vmax.f32 %v643_v3, %v688_v4  ;;  %v1562_v9 = vpop.f32.mrb[23].mxu0 }
 0x58c   :  { %v1416_v9 = vld [vmem:[%s2074_s9 + $0x2] ss:$0 sm:$0xff] }
 0x58d   :  { %v690_v10 = vsub.f32 %v643_v3, %v689_v8  ;;  %v693_v11 = vsub.f32 %v688_v4, %v689_v8 }
 0x58f   :  { %v691_v12 = vmul.f32 1.442695, %v690_v10  ;;  %v694_v13 = vmul.f32 1.442695, %v693_v11 }
 0x591   :  { %1654 = vpow2.f32 %v691_v12 }
 0x592   :  { %1656 = vpow2.f32 %v694_v13 }
 0x59b   :  { %v1655_v14 = vpop.eup %1654 }
 0x59c   :  { %v1657_v15 = vpop.eup %1656 }
 0x59d   :  { %v696_v16 = vadd.f32 %v1657_v15, %v1655_v14 }
 0x59f   :  { %1658 = vrcp.f32 %v696_v16 }
 0x5a9   :  { %v1659_v17 = vpop.eup %1658 }
 0x5aa   :  { %v698_v18 = vmul.f32 %v1659_v17, %v1926_v1 }
 0x5ac   :  { %v699_v19 = vmul.f32 %v1655_v14, %v698_v18  ;;  %v700_v20 = vmul.f32 %v1657_v15, %v698_v18 }
 0x5ae   :  { %v701_v21 = vpack.c.bf16 %v699_v19, %v699_v19  ;;  %v702_v22 = vpack.c.bf16 %v700_v20, %v700_v20 }
 0x5b0   :  { %1566 = vmatmul.mubr.msk.bf16.vlgmr.msra.gmra.mrb[20].mxu1 %vm364_vm4, %v701_v21  ;;  %1572 = vmatmul.mubr.msk.bf16.vlgmr.msra.gmra.mrb[24].mxu0 %vm364_vm4, %v702_v22 }
 0x5b1   :  { %1587 = vmatprep.mubr.msk.bf16.mxu0 %vm140_vm2, %v1938_v29  ;;  %1579 = vmatprep.mubr.msk.bf16.mxu1 %vm1748_vm0, %v1747_v0 }
 0x5b2   :  { %1576 = vmatpush3.bf16.msra.mxu1 %v811_v31  ;;  %1584 = vmatpush3.bf16.msra.mxu0 %v818_v25 }
 0x5b3   :  { %1577 = vmatprep.subr.bf16.mxu1 %v1747_v0  ;;  %1585 = vmatprep.subr.bf16.mxu0 %v819_v34 }
 0x5b6   :  { %1578 = vmatpush3.bf16.msra.mxu1 %v812_v35  ;;  %1586 = vmatpush3.bf16.msra.mxu0 %v819_v34 }
 0x5b7   :  { %1599 = vmatprep.subr.bf16.mxu0 %v1747_v0  ;;  %1591 = vmatprep.subr.bf16.mxu1 %v825_v38 }
 0x683   :  { %v743_v39 = vpop.f32.mrb[20].mxu1  ;;  %v789_v40 = vpop.f32.mrb[24].mxu0 }
 0x684   :  { %v795_v41 = vsel %vm140_vm2, %v743_v39, 0.0  ;;  %v796_v42 = vsel %vm140_vm2, %v789_v40, 0.0  ;;  %v1567_v43 = vpop.f32.mrb[21].mxu1  ;;  %v1573_v44 = vpop.f32.mrb[25].mxu0 }
 0x685   :  { %v797_v45 = vadd.f32 %v796_v42, %v795_v41  ;;  %v746_v46 = vpop.f32.mrb[22].mxu1  ;;  %v792_v47 = vpop.f32.mrb[26].mxu0 }
 0x686   :  { %v1568_v48 = vpop.f32.mrb[23].mxu1  ;;  %v1574_v49 = vpop.f32.mrb[27].mxu0 }
 0x687   :  { %v798_v50 = vmax.f32 %v797_v45, 0.0 }
 0x689   :  { %800 = vst.msk [vmem:[#allocation2 + $0x10] sm:$0xff] %vm140_vm2, %v798_v50 }
 0x690   :  { %v833_v53 = vld [vmem:[#allocation2 + $0x10] sm:$0xff] }
 0x691   :  { %v834_v54 = vpack.c.bf16 %v833_v53, %v833_v53 }
 0x693   :  { %1580 = vmatmul.mubr.msk.bf16.vlgmr.msra.gmra.mrb[24].mxu1 %vm140_vm2, %v834_v54  ;;  %1588 = vmatmul.mubr.msk.bf16.vlgmr.msra.gmra.mrb[28].mxu0 %vm140_vm2, %v834_v54 }
 0x694   :  { %1592 = vmatpush3.bf16.msra.mxu1 %v825_v38  ;;  %1595 = vmatprep.mubr.msk.bf16.mxu1 %vm140_vm2, %v1938_v29 }
 0x695   :  { %1593 = vmatprep.subr.bf16.mxu1 %v826_v55  ;;  %1601 = vmatprep.mubr.msk.bf16.mxu0 %vm1748_vm0, %v1747_v0 }
 0x698   :  { %1594 = vmatpush3.bf16.msra.mxu1 %v826_v55 }
 0x699   :  { %1605 = vmatprep.subr.bf16.mxu1 %v1747_v0 }
 0x69b   :  { %1596 = vmatmul.mubr.msk.bf16.vlgmr.msra.gmra.mrb[28].mxu1 %vm140_vm2, %v834_v54 }
 0x69c   :  { %1607 = vmatprep.mubr.msk.bf16.mxu1 %vm1748_vm0, %v1747_v0 }
 0x766   :  { %v878_v57 = vpop.f32.mrb[24].mxu1  ;;  %v1589_v58 = vpop.f32.mrb[28].mxu0 }
 0x767   :  { %v1581_v59 = vpop.f32.mrb[25].mxu1  ;;  %v930_v29 = vpop.f32.mrb[29].mxu0  ;;  %v939_v6 = vadd.f32 %v1589_v58, %v1413_v56  ;;  %v879_v10 = vadd.f32 %v1411_v5, %v878_v57  ;;  %v1311_v5 = vld [vmem:[%s2075_s10 + $0x18] sm:$0xff] }
 0x768   :  { %v931_v60 = vadd.f32 %v1413_v56, %v930_v29  ;;  %v881_v61 = vpop.f32.mrb[26].mxu1  ;;  %v1590_v62 = vpop.f32.mrb[30].mxu0 }
 0x769   :  { %v1582_v63 = vpop.f32.mrb[27].mxu1  ;;  %v933_v2 = vpop.f32.mrb[31].mxu0  ;;  %v1095_v15 = vpack.c.bf16 %v939_v6, %v939_v6  ;;  %v1001_v19 = vpack.c.bf16 %v879_v10, %v879_v10 }
 0x76a   :  { %v1002_v3 = vpack.c.bf16 %v931_v60, %v931_v60  ;;  %v934_v4 = vadd.f32 %v1413_v56, %v933_v2  ;;  %v1308_v63 = vld [vmem:[%s2075_s10] sm:$0xff]  ;;  %v1309_v2 = vld [vmem:[%s2075_s10 + $0x8] sm:$0xff] }
 0x76b   :  { %v1097_v21 = vsel %vm140_vm2, %v1095_v15, 0 }
 0x76c   :  { %v1007_v7 = vsel %vm140_vm2, %v1002_v3, 0  ;;  %v1050_v8 = vpack.c.bf16 %v934_v4, %v934_v4  ;;  %v1310_v3 = vld [vmem:[%s2075_s10 + $0x10] sm:$0xff]  ;;  %v1313_v4 = vpack.c.bf16 %v1309_v2, %v1308_v63 }
 0x76d   :  { %1600 = vmatpush3.bf16.xpose.msra.mxu0 %v1007_v7  ;;  %v1314_v6 = vpack.c.bf16 %v1311_v5, %v1310_v3 }
 0x76e   :  { %v1052_v11 = vsel %vm140_vm2, %v1050_v8, 0  ;;  %v1597_v12 = vpop.f32.mrb[28].mxu1  ;;  %1611 = vmatprep.subr.bf16.mxu0 %v1747_v0 }
 0x76f   :  { %v2009_v13 = vadd.f32 %v1597_v12, %v1416_v9  ;;  %v984_v14 = vpop.f32.mrb[29].mxu1  ;;  %1606 = vmatpush3.bf16.xpose.msra.mxu1 %v1052_v11 }
 0x770   :  { %v985_v16 = vadd.f32 %v1416_v9, %v984_v14  ;;  %v1598_v17 = vpop.f32.mrb[30].mxu1  ;;  %1617 = vmatprep.subr.bf16.mxu1 %v1747_v0 }
 0x771   :  { %v987_v18 = vpop.f32.mrb[31].mxu1  ;;  %v1000_v57 = vpack.c.bf16 %v2009_v13, %v2009_v13 }
 0x772   :  { %v998_v20 = vpack.c.bf16 %v985_v16, %v985_v16  ;;  %v988_v22 = vadd.f32 %v1416_v9, %v987_v18 }
 0x773   :  { %v1257_v62 = vsel %vm368_vm3, %v1000_v57, 0 }
 0x774   :  { %1602 = vmatmul.mubr.msk.bf16.vlgmr.msra.gmra.mrb[32].mxu0 %vm140_vm2, %v1001_v19  ;;  %v1165_v23 = vsel %vm368_vm3, %v998_v20, 0  ;;  %v999_v24 = vpack.c.bf16 %v988_v22, %v988_v22 }
 0x775   :  { %1612 = vmatpush3.bf16.xpose.msra.mxu0 %v1097_v21  ;;  %1613 = vmatprep.mubr.msk.bf16.mxu0 %vm1748_vm0, %v1747_v0 }
 0x776   :  { %1608 = vmatmul.mubr.msk.bf16.vlgmr.msra.gmra.mrb[32].mxu1 %vm140_vm2, %v1001_v19  ;;  %1623 = vmatprep.subr.bf16.mxu0 %v1747_v0  ;;  %v1211_v25 = vsel %vm368_vm3, %v999_v24, 0 }
 0x777   :  { %1618 = vmatpush3.bf16.msra.mxu1 %v1165_v23  ;;  %1619 = vmatprep.mubr.msk.bf16.mxu1 %vm1748_vm0, %v1747_v0 }
 0x778   :  { %1629 = vmatprep.subr.bf16.mxu1 %v1747_v0 }
 0x77c   :  { %1614 = vmatmul.mubr.msk.bf16.vlgmr.msra.gmra.mrb[36].mxu0 %vm140_vm2, %v1001_v19 }
 0x77d   :  { %1624 = vmatpush3.bf16.msra.mxu0 %v1211_v25  ;;  %1625 = vmatprep.mubr.msk.bf16.mxu0 %vm1748_vm0, %v1747_v0 }
 0x77e   :  { %1635 = vmatprep.subr.bf16.mxu0 %v1747_v0 }
 0x847   :  { %v1043_v26 = vpop.f32.mrb[32].mxu0 }
 0x848   :  { %v1603_v28 = vpop.f32.mrb[33].mxu0  ;;  %v1049_v32 = vmul.f32 0.17677669, %v1043_v26  ;;  %v1425_v26 = vld [vmem:[%s2076_s11] ss:$0 sm:$0xff] }
 0x849   :  { %v1046_v30 = vpop.f32.mrb[34].mxu0  ;;  %v1088_v31 = vpop.f32.mrb[32].mxu1 }
 0x84a   :  { %v1094_v27 = vmul.f32 0.17677669, %v1088_v31  ;;  %v1604_v33 = vpop.f32.mrb[35].mxu0  ;;  %v1609_v34 = vpop.f32.mrb[33].mxu1 }
 0x84b   :  { %v1091_v35 = vpop.f32.mrb[34].mxu1 }
 0x84c   :  { %v1140_v36 = vmax.f32 %v1049_v32, %v1094_v27  ;;  %v1610_v37 = vpop.f32.mrb[35].mxu1 }
 0x84f   :  { %v1133_v38 = vpop.f32.mrb[36].mxu0 }
 0x850   :  { %v1139_v39 = vmul.f32 0.17677669, %v1133_v38  ;;  %v1615_v40 = vpop.f32.mrb[37].mxu0 }
 0x851   :  { %v1136_v41 = vpop.f32.mrb[38].mxu0 }
 0x852   :  { %v1141_v42 = vmax.f32 %v1140_v36, %v1139_v39  ;;  %v1616_v43 = vpop.f32.mrb[39].mxu0 }
 0x854   :  { %v1142_v44 = vsub.f32 %v1049_v32, %v1141_v42  ;;  %v1145_v45 = vsub.f32 %v1094_v27, %v1141_v42  ;;  %v1148_v46 = vsub.f32 %v1139_v39, %v1141_v42 }
 0x856   :  { %v1143_v47 = vmul.f32 1.442695, %v1142_v44  ;;  %v1146_v48 = vmul.f32 1.442695, %v1145_v45  ;;  %v1149_v49 = vmul.f32 1.442695, %v1148_v46 }
 0x858   :  { %1660 = vpow2.f32 %v1143_v47 }
 0x859   :  { %1662 = vpow2.f32 %v1146_v48 }
 0x85a   :  { %1664 = vpow2.f32 %v1149_v49 }
 0x862   :  { %v1661_v50 = vpop.eup %1660 }
 0x863   :  { %v1663_v51 = vpop.eup %1662 }
 0x864   :  { %v1151_v52 = vadd.f32 %v1663_v51, %v1661_v50  ;;  %v1665_v53 = vpop.eup %1664 }
 0x866   :  { %v1152_v54 = vadd.f32 %v1665_v53, %v1151_v52 }
 0x868   :  { %1666 = vrcp.f32 %v1152_v54 }
 0x872   :  { %v1667_v55 = vpop.eup %1666 }
 0x873   :  { %v1154_v56 = vmul.f32 %v1667_v55, %v1926_v1 }
 0x875   :  { %v1155_v58 = vmul.f32 %v1661_v50, %v1154_v56  ;;  %v1156_v59 = vmul.f32 %v1663_v51, %v1154_v56  ;;  %v1157_v29 = vmul.f32 %v1665_v53, %v1154_v56 }
 0x877   :  { %v1158_v60 = vpack.c.bf16 %v1155_v58, %v1155_v58  ;;  %v1159_v61 = vpack.c.bf16 %v1156_v59, %v1156_v59  ;;  %v1160_v1 = vpack.c.bf16 %v1157_v29, %v1157_v29 }
 0x879   :  { %1620 = vmatmul.mubr.msk.bf16.vlgmr.msra.gmra.mrb[36].mxu1 %vm364_vm4, %v1158_v60  ;;  %1626 = vmatmul.mubr.msk.bf16.vlgmr.msra.gmra.mrb[40].mxu0 %vm364_vm4, %v1159_v61 }
 0x87a   :  { %1630 = vmatpush3.bf16.msra.mxu1 %v1257_v62  ;;  %1631 = vmatprep.mubr.msk.bf16.mxu1 %vm1748_vm0, %v1747_v0 }
 0x87b   :  { %1639 = vmatprep.mubr.msk.bf16.mxu0 %vm1748_vm0, %v1747_v0  ;;  %1636 = vmatpush3.bf16.msra.mxu0 %v1313_v4 }
 0x87c   :  { %1637 = vmatprep.subr.bf16.mxu0 %v1747_v0 }
 0x87f   :  { %1638 = vmatpush3.bf16.msra.mxu0 %v1314_v6 }
 0x881   :  { %1632 = vmatmul.mubr.msk.bf16.vlgmr.msra.gmra.mrb[40].mxu1 %vm364_vm4, %v1160_v1 }
 0x94c   :  { %v1201_v7 = vpop.f32.mrb[36].mxu1  ;;  %v1247_v8 = vpop.f32.mrb[40].mxu0 }
 0x94d   :  { %v1299_v9 = vsel %vm140_vm2, %v1201_v7, 0.0  ;;  %v1300_v10 = vsel %vm140_vm2, %v1247_v8, 0.0  ;;  %v1621_v11 = vpop.f32.mrb[37].mxu1  ;;  %v1627_v12 = vpop.f32.mrb[41].mxu0 }
 0x94e   :  { %v1301_v13 = vadd.f32 %v1300_v10, %v1299_v9  ;;  %v1204_v14 = vpop.f32.mrb[38].mxu1  ;;  %v1250_v15 = vpop.f32.mrb[42].mxu0 }
 0x94f   :  { %v1622_v16 = vpop.f32.mrb[39].mxu1  ;;  %v1628_v17 = vpop.f32.mrb[43].mxu0 }
 0x954   :  { %v1293_v18 = vpop.f32.mrb[40].mxu1 }
 0x955   :  { %v1302_v19 = vsel %vm140_vm2, %v1293_v18, 0.0  ;;  %v1633_v20 = vpop.f32.mrb[41].mxu1 }
 0x956   :  { %v1303_v21 = vadd.f32 %v1302_v19, %v1301_v13  ;;  %v1296_v0 = vpop.f32.mrb[42].mxu1 }
 0x957   :  { %v1634_v22 = vpop.f32.mrb[43].mxu1 }
 0x958   :  { %v1304_v23 = vmax.f32 %v1303_v21, 0.0 }
 0x95a   :  { %1306 = vst.msk [vmem:[#allocation2 + $0x18] sm:$0xff] %vm140_vm2, %v1304_v23 }
 0x961   :  { %v1307_v24 = vld [vmem:[#allocation2 + $0x18] sm:$0xff] }
 0x962   :  { %v1312_v25 = vpack.c.bf16 %v1307_v24, %v1307_v24 }
 0x964   :  { %1640 = vmatmul.mubr.msk.bf16.vlgmr.msra.gmra.mrb[44].mxu0 %vm140_vm2, %v1312_v25 }
 0xa37   :  { %v1359_v28 = vpop.f32.mrb[44].mxu0 }
 0xa38   :  { %v1360_v30 = vadd.f32 %v1425_v26, %v1359_v28  ;;  %v1641_v31 = vpop.f32.mrb[45].mxu0 }
 0xa39   :  { %v1362_v32 = vpop.f32.mrb[46].mxu0 }
 0xa3a   :  { %v1642_v27 = vpop.f32.mrb[47].mxu0  ;;  %v1366_v33 = vsel %vm1365_vm5, %v1360_v30, -inf }
 0xa3b   :  { %1367 = vmax.xlane.f32.xlu0 %v1366_v33 }
 0xac8   :  { %v1368_v34 = vpop.xlane.xlu0 %1367 }
 0xac9   :  { %v1369_v35 = vsub.f32 %v1360_v30, %v1368_v34 }
 0xacb   :  { %v1370_v36 = vmul.f32 1.442695, %v1369_v35 }
 0xacd   :  { %1668 = vpow2.f32 %v1370_v36 }
 0xad7   :  { %v1669_v37 = vpop.eup %1668 }
 0xad8   :  { %v1372_v38 = vsel %vm1365_vm5, %v1669_v37, 0.0 }
 0xad9   :  { %1373 = vadd.xlane.f32.xlu0 %v1372_v38 }
 0xb66   :  { %v1374_v39 = vpop.xlane.xlu0 %1373 }
 0xb67   :  { %1670 = vlog2.f32 %v1374_v39 }
 0xb71   :  { %v1671_v40 = vpop.eup %1670 }
 0xb72   :  { %v1376_v41 = vmul.f32 0.6931472, %v1671_v40 }
 0xb74   :  { %v1377_v42 = vsub.f32 %v1369_v35, %v1376_v41 }
 0xb76   :  { %1378 = vst.msk [vmem:[%s2077_s12] sm:$0xff] %vm1365_vm5, %v1377_v42 }
 0xb77   :  { %1383 = vsyncpa [#allocation4], 1 }
 0xb78   :  { %1384 = vsyncpa [#allocation6], 1 }

</bundles_post_ra>
